<compile_context>
chip_gen: v6e
topology: v6e:2x2x1
jax: 0.10.0
libtpu: 0.0.40
codegen_flags: <defaults>
</compile_context>

<pallas_src>
import math

import jax
import jax.numpy as jnp
from jax.experimental import pallas as pl
from jax.experimental.pallas import tpu as pltpu

BATCH = 2
SEQ = 8
HIDDEN = 32           # __C.HIDDEN_SIZE
HEADS = 4             # __C.MULTI_HEAD
DH = HIDDEN // HEADS  # __C.HIDDEN_SIZE_HEAD
NEG = -1e9


def mha_kernel(x_ref, wqkv_ref, bqkv_ref, madd_ref, wm_ref, bm_ref, out_ref):
    """Single invocation: fused qkv projection, block-diag batched attention, merge.

    Shapes (all static, N = B*S):
      x_ref    : (3N, H)   rows [0:N)=q, [N:2N)=k, [2N:3N)=v
      wqkv_ref : (H, 3H)   [Wq.T*scale | Wk.T | Wv.T], columns (head, dim)-ordered
      bqkv_ref : (1, 3H)
      madd_ref : (HEADS*N, N) additive mask: 0 for same-batch valid keys, -1e9 otherwise
      wm_ref   : (H, H)    linear_merge weight, transposed
      bm_ref   : (1, H)
      out_ref  : (N, H)
    """
    n3, hidden = x_ref.shape
    n = n3 // 3
    heads = HEADS
    dh = hidden // heads
    f32 = jnp.float32

    # ---- fused q/k/v projection: one MXU matmul (96 live output lanes) ---------
    proj = jnp.dot(x_ref[...], wqkv_ref[...], preferred_element_type=f32)
    proj = proj + bqkv_ref[...]                               # (3N, 3H)
    q_p = proj[0:n, 0:hidden]                                 # (N, H), scale pre-folded
    k_p = proj[n:2 * n, hidden:2 * hidden]                    # (N, H)
    v_p = proj[2 * n:3 * n, 2 * hidden:3 * hidden]            # (N, H)

    # head selector hm[h, c] = 1.0 iff feature column c belongs to head h
    # (derived in-kernel from 2-D iota -> no extra DMA operand).
    row_h = jax.lax.broadcasted_iota(jnp.int32, (heads, hidden), 0)
    col_c = jax.lax.broadcasted_iota(jnp.int32, (heads, hidden), 1)
    lo = row_h * dh
    hm = jnp.logical_and(col_c >= lo, col_c < lo + dh).astype(f32)   # (HEADS, H)

    # ---- block-diagonal batched attention: all (head, batch) blocks in 2 matmuls ----
    # q_big rows are ordered (h, b, s); each head-h row keeps only its own feature block,
    # so a single contraction over H yields per-head scores.
    q_big = (hm[:, None, :] * q_p[None, :, :]).reshape(heads * n, hidden)   # (HN, H)

    scores = jax.lax.dot_general(                              # (HN, N) == q_big @ k_p.T
        q_big, k_p,
        dimension_numbers=(((1,), (1,)), ((), ())),
        preferred_element_type=f32)
    scores = scores + madd_ref[...]                            # mask cross-batch / padded keys

    # exact f32 softmax over the key axis (no approximate reciprocal)
    m = jnp.max(scores, axis=-1, keepdims=True)
    e = jnp.exp(scores - m)
    att = e / jnp.sum(e, axis=-1, keepdims=True)
    # TODO(synk): nn.Dropout on att_map is identity in eval mode; training dropout omitted.

    ctx_full = jnp.dot(att, v_p, preferred_element_type=f32)   # (HN, H)

    # keep each row-block's own head columns and collapse heads back to the dense
    # (N, HEADS*DH) = (N, H) layout expected by linear_merge (cross-head sum is just
    # collecting disjoint column blocks).
    ctx_dense = jnp.sum(ctx_full.reshape(heads, n, hidden) * hm[:, None, :], axis=0)

    # ---- merge projection: single matmul -----------------------------------------
    out = jnp.dot(ctx_dense, wm_ref[...], preferred_element_type=f32) + bm_ref[...]
    out_ref[...] = out.astype(out_ref.dtype)


def mhatt_forward(v, k, q, mask, params):
    """params = (wq, bq, wk, bk, wv, bv, wm, bm); w* are (H,H) PyTorch (out,in), b* (H,)."""
    wq, bq, wk, bk, wv, bv, wm, bm = params
    B, S, H = q.shape
    N = B * S
    scale = 1.0 / math.sqrt(DH)

    # --- wrapper-side layout plumbing (trace-time; keeps kernel transpose-free) ---
    # fused projection weight/bias; 1/sqrt(DH) folded into the q block
    wqkv = jnp.concatenate([wq.T * scale, wk.T, wv.T], axis=1)        # (H, 3H)
    bqkv = jnp.concatenate([bq * scale, bk, bv]).reshape(1, 3 * H)    # (1, 3H)
    wm_t = wm.T                                                       # (H, H)
    bm2 = bm.reshape(1, H)

    # stack q/k/v rows into one operand (one DMA instead of three)
    x = jnp.concatenate([q.reshape(N, H), k.reshape(N, H), v.reshape(N, H)], axis=0)

    # additive mask for the block-diagonal batched attention:
    # score row index n = (h, b, s) with b = (n // S) % B; column j = (b', s').
    pad = mask.reshape(B * S) > 0.5                      # True == masked key
    row_b = (jnp.arange(HEADS * N) // S) % B
    col_b = jnp.arange(N) // S
    same_batch = row_b[:, None] == col_b[None, :]
    madd = jnp.where(same_batch & (~pad)[None, :], 0.0, NEG).astype(jnp.float32)  # (HN, N)

    vmem = pl.BlockSpec(memory_space=pltpu.MemorySpace.VMEM)
    out = pl.pallas_call(
        mha_kernel,
        out_shape=jax.ShapeDtypeStruct((N, H), jnp.float32),
        in_specs=[vmem] * 6,
        out_specs=vmem,
    )(x, wqkv, bqkv, madd, wm_t, bm2)
    return out.reshape(B, S, H)


def mhatt_reference(v, k, q, mask, params):
    """Pure-JAX reference mirroring the PyTorch forward exactly (pinned to high precision)."""
    wq, bq, wk, bk, wv, bv, wm, bm = params
    B, S, H = q.shape
    hi = jax.lax.Precision.HIGHEST

    def proj(x, w, b):
        y = jnp.dot(x, w.T, precision=hi) + b
        return y.reshape(B, S, HEADS, DH).transpose(0, 2, 1, 3)       # (B, nh, S, dh)

    qh, kh, vh = proj(q, wq, bq), proj(k, wk, bk), proj(v, wv, bv)
    scores = jnp.einsum("bhqd,bhkd->bhqk", qh, kh, precision=hi) / math.sqrt(DH)
    scores = jnp.where(mask > 0.5, NEG, scores)                       # masked_fill(mask, -1e9)
    att = jax.nn.softmax(scores, axis=-1)
    out = jnp.einsum("bhqk,bhkd->bhqd", att, vh, precision=hi)
    out = out.transpose(0, 2, 1, 3).reshape(B, S, H)
    return jnp.dot(out, wm.T, precision=hi) + bm


if __name__ == "__main__":
    key = jax.random.PRNGKey(0)
    ks = jax.random.split(key, 12)

    def w(k_):
        return jax.random.normal(k_, (HIDDEN, HIDDEN), jnp.float32) * 0.05

    def b(k_):
        return jax.random.normal(k_, (HIDDEN,), jnp.float32) * 0.01

    params = (w(ks[0]), b(ks[1]), w(ks[2]), b(ks[3]),
              w(ks[4]), b(ks[5]), w(ks[6]), b(ks[7]))

    q_in = jax.random.normal(ks[8], (BATCH, SEQ, HIDDEN), jnp.float32)
    k_in = jax.random.normal(ks[9], (BATCH, SEQ, HIDDEN), jnp.float32)
    v_in = jax.random.normal(ks[10], (BATCH, SEQ, HIDDEN), jnp.float32)

    # Key-padding mask: batch 0 fully valid, batch 1 masks the last 2 key positions.
    valid_len = jnp.array([SEQ, SEQ - 2])
    pos = jnp.arange(SEQ)[None, :]
    mask = (pos >= valid_len[:, None]).astype(jnp.float32).reshape(BATCH, 1, 1, SEQ)

    out = jax.block_until_ready(mhatt_forward(v_in, k_in, q_in, mask, params))
    ref = mhatt_reference(v_in, k_in, q_in, mask, params)

    assert out.shape == (BATCH, SEQ, HIDDEN)
    # Softmax is now exact; remaining tolerance only covers MXU f32 multi-pass rounding
    # and the (numerically benign) folding of 1/sqrt(DH) into the q-projection weights.
    err = jnp.max(jnp.abs(out - ref))
    assert jnp.allclose(out, ref, atol=2e-3, rtol=2e-3), f"max abs err {err}"

    print("KERNEL_OK")
</pallas_src>

<mosaic_0001>
module attributes {stable_mosaic.version = 11 : i64} {
  func.func @mha_kernel(%arg0: memref<48x32xf32, #tpu.memory_space<vmem>>, %arg1: memref<32x96xf32, #tpu.memory_space<vmem>>, %arg2: memref<1x96xf32, #tpu.memory_space<vmem>>, %arg3: memref<64x16xf32, #tpu.memory_space<vmem>>, %arg4: memref<32x32xf32, #tpu.memory_space<vmem>>, %arg5: memref<1x32xf32, #tpu.memory_space<vmem>>, %arg6: memref<16x32xf32, #tpu.memory_space<vmem>>) attributes {dimension_semantics = [], scalar_prefetch = 0 : i64, scratch_operands = 0 : i64, tpu.core_type = #tpu.core_type<tc>} {
    %c0 = arith.constant 0 : index
    %c0_0 = arith.constant 0 : index
    %0 = vector.load %arg0[%c0, %c0_0] : memref<48x32xf32, #tpu.memory_space<vmem>>, vector<48x32xf32>
    %c0_1 = arith.constant 0 : index
    %c0_2 = arith.constant 0 : index
    %1 = vector.load %arg1[%c0_1, %c0_2] : memref<32x96xf32, #tpu.memory_space<vmem>>, vector<32x96xf32>
    %cst = arith.constant dense<0.000000e+00> : vector<48x96xf32>
    %2 = tpu.matmul %0, %1, %cst {dimension_numbers = #tpu.dot_dimension_numbers<[1], [0], [0], [1], [0, 0, 1, 1], [], []>} : vector<48x32xf32>, vector<32x96xf32>, vector<48x96xf32> -> vector<48x96xf32>
    %c0_3 = arith.constant 0 : index
    %c0_4 = arith.constant 0 : index
    %3 = vector.load %arg2[%c0_3, %c0_4] : memref<1x96xf32, #tpu.memory_space<vmem>>, vector<1x96xf32>
    %4 = vector.broadcast %3 : vector<1x96xf32> to vector<48x96xf32>
    %5 = arith.addf %2, %4 : vector<48x96xf32>
    %6 = vector.extract_strided_slice %5 {offsets = [0, 0], sizes = [16, 32], strides = [1, 1]} : vector<48x96xf32> to vector<16x32xf32>
    %7 = vector.extract_strided_slice %5 {offsets = [16, 32], sizes = [16, 32], strides = [1, 1]} : vector<48x96xf32> to vector<16x32xf32>
    %8 = vector.extract_strided_slice %5 {offsets = [32, 64], sizes = [16, 32], strides = [1, 1]} : vector<48x96xf32> to vector<16x32xf32>
    %9 = tpu.iota {dimensions = array<i32: 0>} : vector<4x32xi32>
    %10 = tpu.iota {dimensions = array<i32: 1>} : vector<4x32xi32>
    %c8_i32 = arith.constant 8 : i32
    %11 = vector.broadcast %c8_i32 : i32 to vector<4x32xi32>
    %12 = arith.muli %9, %11 : vector<4x32xi32>
    %13 = arith.cmpi sge, %10, %12 : vector<4x32xi32>
    %c8_i32_5 = arith.constant 8 : i32
    %14 = vector.broadcast %c8_i32_5 : i32 to vector<4x32xi32>
    %15 = arith.addi %12, %14 : vector<4x32xi32>
    %16 = arith.cmpi slt, %10, %15 : vector<4x32xi32>
    %17 = arith.andi %13, %16 : vector<4x32xi1>
    %18 = arith.extui %17 : vector<4x32xi1> to vector<4x32xi32>
    %19 = arith.sitofp %18 : vector<4x32xi32> to vector<4x32xf32>
    %20 = vector.shape_cast %19 : vector<4x32xf32> to vector<4x1x32xf32>
    %21 = vector.shape_cast %6 : vector<16x32xf32> to vector<1x16x32xf32>
    %22 = vector.broadcast %20 : vector<4x1x32xf32> to vector<4x16x32xf32>
    %23 = vector.broadcast %21 : vector<1x16x32xf32> to vector<4x16x32xf32>
    %24 = arith.mulf %22, %23 : vector<4x16x32xf32>
    %25 = vector.shape_cast %24 : vector<4x16x32xf32> to vector<64x32xf32>
    %cst_6 = arith.constant dense<0.000000e+00> : vector<64x16xf32>
    %26 = tpu.matmul %25, %7, %cst_6 {dimension_numbers = #tpu.dot_dimension_numbers<[1], [1], [0], [0], [0, 0, 1, 0], [], []>} : vector<64x32xf32>, vector<16x32xf32>, vector<64x16xf32> -> vector<64x16xf32>
    %c0_7 = arith.constant 0 : index
    %c0_8 = arith.constant 0 : index
    %27 = vector.load %arg3[%c0_7, %c0_8] : memref<64x16xf32, #tpu.memory_space<vmem>>, vector<64x16xf32>
    %28 = arith.addf %26, %27 : vector<64x16xf32>
    %cst_9 = arith.constant dense<0xFF800000> : vector<64xf32>
    %29 = vector.multi_reduction <maximumf>, %28, %cst_9 [1] : vector<64x16xf32> to vector<64xf32>
    %30 = vector.shape_cast %29 : vector<64xf32> to vector<64x1xf32>
    %31 = vector.broadcast %30 : vector<64x1xf32> to vector<64x16xf32>
    %32 = arith.subf %28, %31 : vector<64x16xf32>
    %33 = math.exp %32 : vector<64x16xf32>
    %cst_10 = arith.constant dense<0.000000e+00> : vector<64xf32>
    %34 = vector.multi_reduction <add>, %33, %cst_10 [1] : vector<64x16xf32> to vector<64xf32>
    %35 = vector.shape_cast %34 : vector<64xf32> to vector<64x1xf32>
    %36 = vector.broadcast %35 : vector<64x1xf32> to vector<64x16xf32>
    %37 = arith.divf %33, %36 : vector<64x16xf32>
    %cst_11 = arith.constant dense<0.000000e+00> : vector<64x32xf32>
    %38 = tpu.matmul %37, %8, %cst_11 {dimension_numbers = #tpu.dot_dimension_numbers<[1], [0], [0], [1], [0, 0, 1, 1], [], []>} : vector<64x16xf32>, vector<16x32xf32>, vector<64x32xf32> -> vector<64x32xf32>
    %39 = vector.shape_cast %38 : vector<64x32xf32> to vector<4x16x32xf32>
    %40 = vector.shape_cast %19 : vector<4x32xf32> to vector<4x1x32xf32>
    %41 = vector.broadcast %40 : vector<4x1x32xf32> to vector<4x16x32xf32>
    %42 = arith.mulf %39, %41 : vector<4x16x32xf32>
    %cst_12 = arith.constant dense<0.000000e+00> : vector<16x32xf32>
    %43 = vector.multi_reduction <add>, %42, %cst_12 [0] : vector<4x16x32xf32> to vector<16x32xf32>
    %c0_13 = arith.constant 0 : index
    %c0_14 = arith.constant 0 : index
    %44 = vector.load %arg4[%c0_13, %c0_14] : memref<32x32xf32, #tpu.memory_space<vmem>>, vector<32x32xf32>
    %cst_15 = arith.constant dense<0.000000e+00> : vector<16x32xf32>
    %45 = tpu.matmul %43, %44, %cst_15 {dimension_numbers = #tpu.dot_dimension_numbers<[1], [0], [0], [1], [0, 0, 1, 1], [], []>} : vector<16x32xf32>, vector<32x32xf32>, vector<16x32xf32> -> vector<16x32xf32>
    %c0_16 = arith.constant 0 : index
    %c0_17 = arith.constant 0 : index
    %46 = vector.load %arg5[%c0_16, %c0_17] : memref<1x32xf32, #tpu.memory_space<vmem>>, vector<1x32xf32>
    %47 = vector.broadcast %46 : vector<1x32xf32> to vector<16x32xf32>
    %48 = arith.addf %45, %47 : vector<16x32xf32>
    %c0_18 = arith.constant 0 : index
    %c0_19 = arith.constant 0 : index
    %49 = vector.load %arg6[%c0_18, %c0_19] : memref<16x32xf32, #tpu.memory_space<vmem>>, vector<16x32xf32>
    tpu.vector_store %arg6[%c0_18, %c0_19], %48 {strides = array<i32>} : memref<16x32xf32, #tpu.memory_space<vmem>>, vector<16x32xf32>,
    return
  }
}

</mosaic_0001>

<bundles_post_ra>
// kernel: tpu_custom_call.1
= control target key start
LH: loop header
LB: loop body
LE: loop exit
PB: predicated region body
PF: predicated region fallthrough
CT: control target
= control target key end

     0   :  { %vm41_vm0 = vcmask 261120   ;;  %s1117_s0 = inlined_call_operand.vmem [shape: f32[48,32], index: 0, kind: input, shape index: {}]   ;;  %s1118_s1 = inlined_call_operand.vmem [shape: f32[32,96], index: 1, kind: input, shape index: {}]   ;;  %s1119_s2 = inlined_call_operand.vmem [shape: f32[1,96], index: 2, kind: input, shape index: {}]   ;;  %s1120_s3 = inlined_call_operand.vmem [shape: f32[64,16], index: 3, kind: input, shape index: {}]   ;;  %s1121_s4 = inlined_call_operand.vmem [shape: f32[32,32], index: 4, kind: input, shape index: {}]   ;;  %s1122_s5 = inlined_call_operand.vmem [shape: f32[1,32], index: 5, kind: input, shape index: {}]   ;;  %s1123_s6 = inlined_call_operand.hbm [shape: f32[16,32], index: 6, kind: output, shape index: {}]  }
   0x1   :  { %v33_v0 = vld [vmem:[%s1118_s1 + $0x18] sm:$0xff]  ;;  %v32_v1 = vld [vmem:[%s1118_s1 + $0x10] sm:$0xff]  ;;  %v24_v2 = vld [vmem:[%s1117_s0] sm:$0xff] }
   0x2   :  { %789 = vmatprep.subr.mxu0 %v33_v0  ;;  %v31_v3 = vld [vmem:[%s1118_s1 + $0x8] sm:$0xff]  ;;  %797 = vmatprep.mubr.msk.f32.mxu0 %vm41_vm0, %v24_v2 }
   0x3   :  { %790 = vmatpush3.msra.mxu0 %v33_v0 }
   0x4   :  { %11 = vsyncpa [#allocation3], 0  ;;  %791 = vmatprep.subr.mxu0 %v32_v1  ;;  %v30_v4 = vld [vmem:[%s1118_s1] sm:$0xff]  ;;  %v25_v5 = vld [vmem:[%s1117_s0 + $0x8] sm:$0xff]  ;;  %v155_v8 = vlaneseq  ;;  %v910_v11 = vmov 1966171168  }
   0x5   :  { %792 = vmatpush3.msra.mxu0 %v32_v1  ;;  %v26_v6 = vld [vmem:[%s1117_s0 + $0x10] sm:$0xff]  ;;  %v27_v7 = vld [vmem:[%s1117_s0 + $0x18] sm:$0xff]  ;;  %v168_v12 = vunpack.c.l.s4 %v910_v11  ;;  %v911_v17 = vmov 0.0   ;;  %v989_v30 = vld [vmem:[%s1119_s2] ss:$0 sm:$0xff]  ;;  %s912_s14 = smov 96  }
   0x6   :  { %793 = vmatprep.subr.mxu0 %v31_v3  ;;  %v156_v9 = vshrl.u32 %v155_v8, 7  ;;  %v158_v13 = vand.u32 127, %v155_v8  ;;  %v28_v49 = vld [vmem:[%s1117_s0 + $0x20] sm:$0xff]  ;;  %v29_v50 = vld [vmem:[%s1117_s0 + $0x28] sm:$0xff]  ;;  %vm366_vm4 = vcmask 130048   ;;  %v222_v58 = vld [vmem:[%s1120_s3 + $0x18] sm:$0xff] }
   0x7   :  { %794 = vmatpush3.msra.mxu0 %v31_v3  ;;  %v169_v15 = vunpack.c.0.s8 %v168_v12  ;;  %v220_v51 = vld [vmem:[%s1120_s3 + $0x8] sm:$0xff]  ;;  %v219_v53 = vld [vmem:[%s1120_s3] sm:$0xff]  ;;  %v221_v60 = vld [vmem:[%s1120_s3 + $0x10] sm:$0xff]  ;;  %s914_s16 = smov [#allocation2]  }
   0x8   :  { %795 = vmatprep.subr.mxu0 %v30_v4  ;;  %v159_v10 = vmul.u32 8, %v156_v9  ;;  %v193_v24 = vsub.s32 0, %v156_v9  ;;  %v224_v1 = vld [vmem:[%s1120_s3 + $0x28] sm:$0xff]  ;;  %v225_v12 = vld [vmem:[%s1120_s3 + $0x30] sm:$0xff]  ;;  %s713_s17 = sshll.u32 %s914_s16, 4  ;;  %s714_s17 = int_to_ptr.vmem [resolvable:$true] %s713_s17 }
   0x9   :  { %796 = vmatpush3.msra.mxu0 %v30_v4  ;;  %v172_v16 = vsub.s32 %v169_v15, %v156_v9  ;;  %v226_v15 = vld [vmem:[%s1120_s3 + $0x38] sm:$0xff]  ;;  %s888_s18 = scalar_lea.vmem %s714_s17, 256  ;;  %p893_p1 = scmp.lt.s32.totalorder %s714_s17, %s714_s17 }
   0xa   :  { %798 = vmatmul.mubr.msk.f32.vlgmr.msra.gmra.mxu0 %vm41_vm0, %v25_v5  ;;  %v161_v14 = vadd.s32 8, %v159_v10  ;;  %vm160_vm1 = vcmp.ge.s32.totalorder %v158_v13, %v159_v10  ;;  %p889_p0 = scmp.ne.s32.totalorder %s714_s17, %s888_s18  ;;  %p894_p2 = scmp.lt.s32.totalorder %s888_s18, %s888_s18 }
   0xb   :  { %800 = vmatprep.mubr.msk.f32.mxu0 %vm41_vm0, %v26_v6 }
   0xc   :  { %vm162_vm2 = vcmp.lt.s32.totalorder %v158_v13, %v161_v14  ;;  %p895_p3 = por %p894_p2, %p893_p1 }
   0xd   :  { %vm163_vm3 = vmand %vm160_vm1, %vm162_vm2 }
   0xe   :  { %801 = vmatmul.mubr.msk.f32.gmra.mxu0 %vm41_vm0, %v27_v7  ;;  %v731_v18 = vsel %vm163_vm3, 1.0, %v911_v17  ;;  %v223_v7 = vld [vmem:[%s1120_s3 + $0x20] sm:$0xff]  ;;  %s913_s3 = smov 64   ;;  %p896_p4 = pnand %p895_p3, %p889_p0 }
   0xf   :  { %v173_v19 = vrot.slane %v731_v18, %v172_v16  ;;  %803 = vmatprep.mubr.msk.f32.mxu0 %vm41_vm0, %v28_v49 }
  0x11   :  { %v174_v20 = vcombine.high %v173_v19, %v173_v19  ;;  %v181_v21 = vrot.slane %v173_v19, %v172_v16 }
  0x12   :  { %804 = vmatmul.mubr.msk.f32.gmra.mxu0 %vm41_vm0, %v29_v50 }
  0x13   :  { %v188_v22 = vrot.slane %v174_v20, %v172_v16  ;;  %v189_v23 = vcombine.high %v181_v21, %v181_v21  ;;  %v992_v33 = vrot.slane %v181_v21, %v193_v24 }
  0x15   :  { %v190_v25 = vcombine.high %v188_v22, %v188_v22  ;;  %v980_v26 = vrot.slane %v188_v22, %v193_v24  ;;  %v982_v27 = vrot.slane %v189_v23, %v193_v24 }
  0x17   :  { %v984_v28 = vrot.slane %v190_v25, %v193_v24 }
  0xca   :  { %v799_v29 = vpop.f32.mrf.mxu0 }
  0xcb   :  { %v132_v40 = vadd.f32 %v799_v29, %v989_v30 }
  0xcc   :  { %v126_v31 = vpop.f32.mrf.mxu0 }
  0xcd   :  { %v127_v32 = vadd.f32 %v989_v30, %v126_v31  ;;  %v212_v42 = vmul.f32 %v992_v33, %v132_v40  ;;  %v214_v44 = vmul.f32 %v980_v26, %v132_v40  ;;  %v216_v46 = vmul.f32 %v982_v27, %v132_v40 }
  0xce   :  { %v802_v34 = vpop.f32.mrf.mxu0  ;;  %v218_v48 = vmul.f32 %v984_v28, %v132_v40 }
  0xcf   :  { %v142_v35 = vadd.f32 %v802_v34, %v989_v30  ;;  %v211_v36 = vmul.f32 %v992_v33, %v127_v32  ;;  %v213_v43 = vmul.f32 %v980_v26, %v127_v32  ;;  %v215_v45 = vmul.f32 %v982_v27, %v127_v32 }
  0xd0   :  { %v136_v37 = vpop.f32.mrf.mxu0  ;;  %v217_v47 = vmul.f32 %v984_v28, %v127_v32 }
  0xd1   :  { %231 = vrot.lane.b32.xlu0 %v142_v35, %s912_s14  ;;  %810 = vmatprep.mubr.msk.f32.mxu1 %vm41_vm0, %v211_v36  ;;  %v137_v38 = vadd.f32 %v989_v30, %v136_v37 }
  0xd5   :  { %229 = vrot.lane.b32.xlu0 %v137_v38, %s912_s14 }
 0x143   :  { %v232_v39 = vpop.permute.xlu0 %231 }
 0x144   :  { %806 = vmatprep.subr.msk.mxu1 %vm41_vm0, %v232_v39 }
 0x145   :  { %807 = vmatpush3.xpose.msk.msra.mxu1 %vm41_vm0, %v232_v39 }
 0x147   :  { %v230_v41 = vpop.permute.xlu0 %229 }
 0x148   :  { %808 = vmatprep.subr.msk.mxu1 %vm41_vm0, %v230_v41 }
 0x149   :  { %809 = vmatpush3.xpose.msk.msra.mxu1 %vm41_vm0, %v230_v41 }
 0x14c   :  { %811 = vmatmul.mubr.msk.f32.vlgmr.msra.gmra.mxu1 %vm41_vm0, %v212_v42 }
 0x14d   :  { %813 = vmatprep.mubr.msk.f32.mxu1 %vm41_vm0, %v213_v43 }
 0x150   :  { %814 = vmatmul.mubr.msk.f32.gmra.mxu1 %vm41_vm0, %v214_v44 }
 0x151   :  { %816 = vmatprep.mubr.msk.f32.mxu1 %vm41_vm0, %v215_v45 }
 0x154   :  { %817 = vmatmul.mubr.msk.f32.gmra.mxu1 %vm41_vm0, %v216_v46 }
 0x155   :  { %819 = vmatprep.mubr.msk.f32.mxu1 %vm41_vm0, %v217_v47 }
 0x158   :  { %820 = vmatmul.mubr.msk.f32.gmra.mxu1 %vm41_vm0, %v218_v48 }
 0x20c   :  { %v812_v52 = vpop.f32.mrf.mxu1 }
 0x20d   :  { %v333_v54 = vadd.f32 %v812_v52, %v220_v51 }
 0x20e   :  { %v327_v55 = vpop.f32.mrf.mxu1 }
 0x20f   :  { %v328_v56 = vadd.f32 %v327_v55, %v219_v53  ;;  %v370_v57 = vsel %vm366_vm4, %v333_v54, -inf }
 0x210   :  { %371 = vmax.xlane.f32.xlu1 %v370_v57  ;;  %v815_v59 = vpop.f32.mrf.mxu1 }
 0x211   :  { %v343_v62 = vadd.f32 %v815_v59, %v222_v58  ;;  %v367_v0 = vsel %vm366_vm4, %v328_v56, -inf }
 0x212   :  { %v337_v61 = vpop.f32.mrf.mxu1 }
 0x213   :  { %v338_v63 = vadd.f32 %v337_v61, %v221_v60  ;;  %v376_v6 = vsel %vm366_vm4, %v343_v62, -inf }
 0x214   :  { %v818_v2 = vpop.f32.mrf.mxu1  ;;  %368 = vmax.xlane.f32.xlu1 %v367_v0  ;;  %v805_v0 = vpop.f32.mrf.mxu0 }
 0x215   :  { %v373_v3 = vsel %vm366_vm4, %v338_v63, -inf  ;;  %v353_v5 = vadd.f32 %v818_v2, %v224_v1  ;;  %v152_v1 = vadd.f32 %v805_v0, %v989_v30 }
 0x216   :  { %v347_v4 = vpop.f32.mrf.mxu1  ;;  %374 = vmax.xlane.f32.xlu0 %v373_v3  ;;  %v146_v2 = vpop.f32.mrf.mxu0 }
 0x217   :  { %v348_v9 = vadd.f32 %v347_v4, %v223_v7  ;;  %v382_v10 = vsel %vm366_vm4, %v353_v5, -inf  ;;  %v147_v3 = vadd.f32 %v989_v30, %v146_v2 }
 0x218   :  { %v821_v8 = vpop.f32.mrf.mxu1  ;;  %377 = vmax.xlane.f32.xlu1 %v376_v6 }
 0x219   :  { %v379_v14 = vsel %vm366_vm4, %v348_v9, -inf  ;;  %v363_v16 = vadd.f32 %v821_v8, %v226_v15 }
 0x21a   :  { %v357_v11 = vpop.f32.mrf.mxu1 }
 0x21b   :  { %v358_v13 = vadd.f32 %v357_v11, %v225_v12  ;;  %v388_v18 = vsel %vm366_vm4, %v363_v16, -inf }
 0x21c   :  { %383 = vmax.xlane.f32.xlu1 %v382_v10 }
 0x21d   :  { %v385_v17 = vsel %vm366_vm4, %v358_v13, -inf }
 0x220   :  { %380 = vmax.xlane.f32.xlu1 %v379_v14 }
 0x224   :  { %386 = vmax.xlane.f32.xlu1 %v385_v17 }
 0x228   :  { %389 = vmax.xlane.f32.xlu1 %v388_v18 }
 0x299   :  { %v372_v19 = vpop.xlane.xlu1 %371 }
 0x29a   :  { %v392_v20 = vsub.f32 %v333_v54, %v372_v19 }
 0x29c   :  { %v401_v21 = vmul.f32 1.442695, %v392_v20 }
 0x29d   :  { %v369_v22 = vpop.xlane.xlu1 %368 }
 0x29e   :  { %856 = vpow2.f32 %v401_v21  ;;  %v391_v23 = vsub.f32 %v328_v56, %v369_v22 }
 0x29f   :  { %v375_v24 = vpop.xlane.xlu0 %374 }
 0x2a0   :  { %v399_v25 = vmul.f32 1.442695, %v391_v23  ;;  %v393_v29 = vsub.f32 %v338_v63, %v375_v24 }
 0x2a1   :  { %v378_v31 = vpop.xlane.xlu1 %377 }
 0x2a2   :  { %858 = vpow2.f32 %v399_v25  ;;  %v403_v32 = vmul.f32 1.442695, %v393_v29  ;;  %v394_v34 = vsub.f32 %v343_v62, %v378_v31 }
 0x2a4   :  { %860 = vpow2.f32 %v403_v32  ;;  %v405_v35 = vmul.f32 1.442695, %v394_v34  ;;  %v617_v34 = vld [vmem:[%s1121_s4 + $0x18] sm:$0xff] }
 0x2a5   :  { %v384_v36 = vpop.xlane.xlu1 %383  ;;  %838 = vmatprep.subr.mxu1 %v617_v34 }
 0x2a6   :  { %862 = vpow2.f32 %v405_v35  ;;  %v396_v37 = vsub.f32 %v353_v5, %v384_v36  ;;  %839 = vmatpush3.msra.mxu1 %v617_v34  ;;  %v616_v35 = vld [vmem:[%s1121_s4 + $0x10] sm:$0xff]  ;;  %v615_v36 = vld [vmem:[%s1121_s4 + $0x8] sm:$0xff] }
 0x2a7   :  { %840 = vmatprep.subr.mxu1 %v616_v35 }
 0x2a8   :  { %v409_v38 = vmul.f32 1.442695, %v396_v37  ;;  %841 = vmatpush3.msra.mxu1 %v616_v35  ;;  %v614_v37 = vld [vmem:[%s1121_s4] sm:$0xff] }
 0x2a9   :  { %v381_v39 = vpop.xlane.xlu1 %380  ;;  %842 = vmatprep.subr.mxu1 %v615_v36 }
 0x2aa   :  { %864 = vpow2.f32 %v409_v38  ;;  %v395_v40 = vsub.f32 %v348_v9, %v381_v39  ;;  %843 = vmatpush3.msra.mxu1 %v615_v36 }
 0x2ab   :  { %v1057_v41 = vpop.eup %856  ;;  %844 = vmatprep.subr.mxu1 %v614_v37 }
 0x2ac   :  { %v407_v42 = vmul.f32 1.442695, %v395_v40  ;;  %v418_v43 = vsel %vm366_vm4, %v1057_v41, 0.0  ;;  %845 = vmatpush3.msra.mxu1 %v614_v37 }
 0x2ad   :  { %419 = vadd.xlane.f32.xlu1 %v418_v43  ;;  %v387_v44 = vpop.xlane.xlu1 %386 }
 0x2ae   :  { %866 = vpow2.f32 %v407_v42  ;;  %v397_v45 = vsub.f32 %v358_v13, %v387_v44 }
 0x2af   :  { %v859_v46 = vpop.eup %858 }
 0x2b0   :  { %v411_v47 = vmul.f32 1.442695, %v397_v45  ;;  %v415_v48 = vsel %vm366_vm4, %v859_v46, 0.0 }
 0x2b1   :  { %v861_v49 = vpop.eup %860  ;;  %416 = vadd.xlane.f32.xlu1 %v415_v48  ;;  %v390_v50 = vpop.xlane.xlu1 %389 }
 0x2b2   :  { %868 = vpow2.f32 %v411_v47  ;;  %v398_v51 = vsub.f32 %v363_v16, %v390_v50  ;;  %v421_v54 = vsel %vm366_vm4, %v861_v49, 0.0 }
 0x2b3   :  { %v863_v52 = vpop.eup %862 }
 0x2b4   :  { %v413_v53 = vmul.f32 1.442695, %v398_v51  ;;  %v424_v55 = vsel %vm366_vm4, %v863_v52, 0.0 }
 0x2b5   :  { %422 = vadd.xlane.f32.xlu1 %v421_v54  ;;  %425 = vadd.xlane.f32.xlu0 %v424_v55 }
 0x2b6   :  { %870 = vpow2.f32 %v413_v53 }
 0x2b7   :  { %v865_v56 = vpop.eup %864 }
 0x2b8   :  { %v430_v57 = vsel %vm366_vm4, %v865_v56, 0.0 }
 0x2b9   :  { %431 = vadd.xlane.f32.xlu0 %v430_v57 }
 0x2bb   :  { %v867_v58 = vpop.eup %866 }
 0x2bc   :  { %v427_v59 = vsel %vm366_vm4, %v867_v58, 0.0 }
 0x2bd   :  { %428 = vadd.xlane.f32.xlu1 %v427_v59 }
 0x2bf   :  { %v869_v60 = vpop.eup %868 }
 0x2c0   :  { %v433_v61 = vsel %vm366_vm4, %v869_v60, 0.0 }
 0x2c1   :  { %434 = vadd.xlane.f32.xlu1 %v433_v61 }
 0x2c3   :  { %v871_v62 = vpop.eup %870 }
 0x2c4   :  { %v436_v63 = vsel %vm366_vm4, %v871_v62, 0.0 }
 0x2c5   :  { %437 = vadd.xlane.f32.xlu0 %v436_v63 }
 0x2d2   :  { %459 = vrot.lane.b32.xlu1 %v152_v1, %s913_s3  ;;  %v750_v1 = vld [vmem:[%s1122_s5] ss:$0 sm:$0xff] }
 0x2db   :  { %457 = vrot.lane.b32.xlu0 %v147_v3, %s913_s3 }
 0x336   :  { %v420_v4 = vpop.xlane.xlu1 %419 }
 0x33a   :  { %v417_v5 = vpop.xlane.xlu1 %416 }
 0x33b   :  { %872 = vrcp.f32 %v417_v5 }
 0x33c   :  { %874 = vrcp.f32 %v420_v4 }
 0x33e   :  { %v423_v6 = vpop.xlane.xlu1 %422  ;;  %v426_v7 = vpop.xlane.xlu0 %425 }
 0x33f   :  { %876 = vrcp.f32 %v423_v6 }
 0x340   :  { %878 = vrcp.f32 %v426_v7 }
 0x342   :  { %v432_v10 = vpop.xlane.xlu0 %431 }
 0x346   :  { %v429_v8 = vpop.xlane.xlu1 %428 }
 0x347   :  { %880 = vrcp.f32 %v429_v8 }
 0x348   :  { %v873_v9 = vpop.eup %872  ;;  %882 = vrcp.f32 %v432_v10 }
 0x349   :  { %v440_v11 = vmul.f32 %v873_v9, %v859_v46  ;;  %v875_v14 = vpop.eup %874 }
 0x34a   :  { %v435_v12 = vpop.xlane.xlu1 %434  ;;  %v442_v17 = vmul.f32 %v875_v14, %v1057_v41 }
 0x34b   :  { %826 = vmatprep.mubr.msk.f32.mxu0 %vm366_vm4, %v440_v11  ;;  %884 = vrcp.f32 %v435_v12 }
 0x34c   :  { %v877_v15 = vpop.eup %876 }
 0x34d   :  { %v879_v18 = vpop.eup %878  ;;  %v444_v19 = vmul.f32 %v877_v15, %v861_v49 }
 0x34e   :  { %v438_v30 = vpop.xlane.xlu0 %437  ;;  %v460_v13 = vpop.permute.xlu1 %459  ;;  %v446_v21 = vmul.f32 %v879_v18, %v863_v52 }
 0x34f   :  { %886 = vrcp.f32 %v438_v30  ;;  %822 = vmatprep.subr.mxu0 %v460_v13 }
 0x350   :  { %823 = vmatpush3.msra.mxu0 %v460_v13 }
 0x352   :  { %v458_v16 = vpop.permute.xlu0 %457 }
 0x353   :  { %824 = vmatprep.subr.mxu0 %v458_v16 }
 0x354   :  { %825 = vmatpush3.msra.mxu0 %v458_v16  ;;  %v881_v20 = vpop.eup %880 }
 0x355   :  { %827 = vmatmul.mubr.msk.f32.vlgmr.msra.gmra.mxu0 %vm366_vm4, %v442_v17  ;;  %v883_v22 = vpop.eup %882  ;;  %v448_v23 = vmul.f32 %v881_v20, %v867_v58 }
 0x356   :  { %829 = vmatprep.mubr.msk.f32.mxu0 %vm366_vm4, %v444_v19  ;;  %v450_v25 = vmul.f32 %v883_v22, %v865_v56 }
 0x358   :  { %v885_v24 = vpop.eup %884 }
 0x359   :  { %830 = vmatmul.mubr.msk.f32.gmra.mxu0 %vm366_vm4, %v446_v21  ;;  %v452_v31 = vmul.f32 %v885_v24, %v869_v60 }
 0x35a   :  { %832 = vmatprep.mubr.msk.f32.mxu0 %vm366_vm4, %v448_v23 }
 0x35c   :  { %v887_v29 = vpop.eup %886 }
 0x35d   :  { %833 = vmatmul.mubr.msk.f32.gmra.mxu0 %vm366_vm4, %v450_v25  ;;  %v454_v32 = vmul.f32 %v887_v29, %v871_v62 }
 0x35e   :  { %835 = vmatprep.mubr.msk.f32.mxu0 %vm366_vm4, %v452_v31 }
 0x361   :  { %836 = vmatmul.mubr.msk.f32.gmra.mxu0 %vm366_vm4, %v454_v32 }
 0x415   :  { %v828_v38 = vpop.f32.mrf.mxu0 }
 0x416   :  { %v593_v46 = vmul.f32 %v828_v38, %v992_v33 }
 0x417   :  { %v553_v39 = vpop.f32.mrf.mxu0 }
 0x418   :  { %v592_v45 = vmul.f32 %v553_v39, %v992_v33  ;;  %v607_v55 = vsel %vm41_vm0, %v593_v46, 0.0 }
 0x419   :  { %v831_v40 = vpop.f32.mrf.mxu0 }
 0x41a   :  { %v595_v43 = vmul.f32 %v831_v40, %v980_v26  ;;  %v600_v53 = vsel %vm41_vm0, %v592_v45, 0.0 }
 0x41b   :  { %v563_v41 = vpop.f32.mrf.mxu0 }
 0x41c   :  { %v594_v42 = vmul.f32 %v563_v41, %v980_v26  ;;  %v608_v51 = vsel %vm41_vm0, %v595_v43, 0.0 }
 0x41d   :  { %v834_v44 = vpop.f32.mrf.mxu0  ;;  %v609_v58 = vadd.f32 %v608_v51, %v607_v55 }
 0x41e   :  { %v597_v47 = vmul.f32 %v834_v44, %v982_v27  ;;  %v601_v49 = vsel %vm41_vm0, %v594_v42, 0.0 }
 0x41f   :  { %v573_v48 = vpop.f32.mrf.mxu0  ;;  %v602_v56 = vadd.f32 %v601_v49, %v600_v53 }
 0x420   :  { %v596_v50 = vmul.f32 %v573_v48, %v982_v27  ;;  %v610_v33 = vsel %vm41_vm0, %v597_v47, 0.0 }
 0x421   :  { %v837_v52 = vpop.f32.mrf.mxu0  ;;  %v611_v61 = vadd.f32 %v610_v33, %v609_v58 }
 0x422   :  { %v603_v54 = vsel %vm41_vm0, %v596_v50, 0.0  ;;  %v599_v26 = vmul.f32 %v837_v52, %v984_v28 }
 0x423   :  { %v583_v57 = vpop.f32.mrf.mxu0  ;;  %v604_v60 = vadd.f32 %v603_v54, %v602_v56 }
 0x424   :  { %v598_v59 = vmul.f32 %v583_v57, %v984_v28  ;;  %v612_v27 = vsel %vm41_vm0, %v599_v26, 0.0 }
 0x425   :  { %v613_v0 = vadd.f32 %v612_v27, %v611_v61 }
 0x426   :  { %v605_v62 = vsel %vm41_vm0, %v598_v59, 0.0 }
 0x427   :  { %v606_v63 = vadd.f32 %v605_v62, %v604_v60 }
 0x429   :  { %846 = vmatprep.mubr.msk.f32.mxu1 %vm41_vm0, %v606_v63 }
 0x42a   :  { %847 = vmatmul.mubr.msk.f32.vlgmr.msra.gmra.mxu1 %vm41_vm0, %v613_v0 }
 0x4ea   :  { %v848_v2 = vpop.f32.mrf.mxu1 }
 0x4eb   :  { %v703_v28 = vadd.f32 %v848_v2, %v750_v1 }
 0x4ec   :  { %v697_v3 = vpop.f32.mrf.mxu1 }
 0x4ed   :  { %707 = vst.msk [vmem:[#allocation2 + $0x8] sm:$0xff] %vm41_vm0, %v703_v28  ;;  %v698_v4 = vadd.f32 %v750_v1, %v697_v3 }
 0x4ef   :  { %706 = vst.msk [vmem:[#allocation2] sm:$0xff] %vm41_vm0, %v698_v4 }
 0x4f0   :  { %899 = shalt.err (!%p896_p4)
}
 0x4f1   :  { %s915_s19 = smov 128   ;;  %s916_s5 = smov 8  }
 0x4f2   :  { %719 = dma.vmem_to_hbm [thread:$0]  %s714_s17, 256, %s1123_s6, [#allocation3], %s915_s19, %s915_s19, %s916_s5  }
 0x4f3   :  { %908 = dma.done.wait [#allocation3], 256  }
 0x4f4   :  { %909 = vsyncadd [#allocation3], 4294967040 }
 0x4f5   :  { %723 = vsyncpa [#allocation3], 1 }

</bundles_post_ra>
